<compile_context>
chip_gen: v7x
topology: tpu7x:2x2x1
jax: 0.10.0
libtpu: 0.0.40
codegen_flags: <defaults>
</compile_context>

<pallas_src>
import jax
import jax.numpy as jnp
from jax.experimental import pallas as pl
from jax.experimental.pallas import tpu as pltpu

LANE = 128


def _round_up(x, m):
    return ((x + m - 1) // m) * m


def policy_kernel(s_ref, w1_ref, b1_ref, w2_ref, b2_ref, w3_ref, b3_ref,
                  out_ref):
    """One batch tile: 3 Linear layers (ReLU, ReLU, Identity) + softmax."""
    # Hidden layer 1: Linear (bf16 operands, f32 accumulation) + ReLU in f32.
    h = jnp.dot(s_ref[...], w1_ref[...], preferred_element_type=jnp.float32)
    h = jnp.maximum(h + b1_ref[...], 0.0)
    # Hidden layer 2.
    h = jnp.dot(h.astype(jnp.bfloat16), w2_ref[...],
                preferred_element_type=jnp.float32)
    h = jnp.maximum(h + b2_ref[...], 0.0)
    # Output layer: Linear + Identity (padded action lanes get bias -1e30).
    logits = jnp.dot(h.astype(jnp.bfloat16), w3_ref[...],
                     preferred_element_type=jnp.float32)
    logits = logits + b3_ref[...]
    # Numerically stable softmax over the action (lane) axis; padded lanes
    # underflow to exactly 0 and do not perturb the denominator.
    m = jnp.max(logits, axis=-1, keepdims=True)
    e = jnp.exp(logits - m)
    denom = jnp.sum(e, axis=-1, keepdims=True)
    r = pl.reciprocal(denom, approx=True)   # EUP vrcp -> own VLIW slot
    r = r * (2.0 - denom * r)               # one Newton step -> ~f32 accurate
    out_ref[...] = e * r


def policy_net_forward(s, params, *, block_b=512):
    """Wrapper: lane-pad params, tile the batch, call the Pallas kernel."""
    (w1, b1), (w2, b2), (w3, b3) = params
    B, D = s.shape
    H1, H2, A = w1.shape[1], w2.shape[1], w3.shape[1]
    H1p, H2p, Ap = (_round_up(H1, LANE), _round_up(H2, LANE),
                    _round_up(A, LANE))

    # Lane-pad every layer with exact zeros (padded lanes contribute exactly 0
    # to the matmuls).  Output bias padding is -1e30 so padded logits softmax
    # to 0.  Weights -> bf16 for the MXU; biases stay f32.
    w1p = jnp.zeros((D, H1p), jnp.float32).at[:, :H1].set(w1).astype(jnp.bfloat16)
    b1p = jnp.zeros((1, H1p), jnp.float32).at[:, :H1].set(b1)
    w2p = jnp.zeros((H1p, H2p), jnp.float32).at[:H1, :H2].set(w2).astype(jnp.bfloat16)
    b2p = jnp.zeros((1, H2p), jnp.float32).at[:, :H2].set(b2)
    w3p = jnp.zeros((H2p, Ap), jnp.float32).at[:H2, :A].set(w3).astype(jnp.bfloat16)
    b3p = jnp.full((1, Ap), -1e30, jnp.float32).at[:, :A].set(b3)

    # Batch tile: multiple of 16 (bf16 sublane packing); even at block_b=512
    # the double-buffered footprint is far below the v7x 64 MiB VMEM.
    TB = _round_up(min(block_b, _round_up(B, 16)), 16)
    B_pad = _round_up(B, TB)
    s_pad = jnp.zeros((B_pad, D), jnp.float32).at[:B].set(s).astype(jnp.bfloat16)

    grid = (B_pad // TB,)
    resident = lambda shape: pl.BlockSpec(shape, lambda i: (0, 0))

    out_pad = pl.pallas_call(
        policy_kernel,
        out_shape=jax.ShapeDtypeStruct((B_pad, Ap), jnp.float32),
        grid=grid,
        in_specs=[
            pl.BlockSpec((TB, D), lambda i: (i, 0)),   # streamed state tile
            resident(w1p.shape), resident(b1p.shape),  # VMEM-resident weights
            resident(w2p.shape), resident(b2p.shape),
            resident(w3p.shape), resident(b3p.shape),
        ],
        out_specs=pl.BlockSpec((TB, Ap), lambda i: (i, 0)),
        compiler_params=pltpu.CompilerParams(
            dimension_semantics=("parallel",)),
    )(s_pad, w1p, b1p, w2p, b2p, w3p, b3p)

    return out_pad[:B, :A]


def init_params(key, state_dim, action_dim, hidden_shape):
    """Deterministic synthetic parameters (PyTorch-like uniform fan-in init)."""
    layer_dims = [state_dim] + list(hidden_shape) + [action_dim]
    params = []
    for j in range(len(layer_dims) - 1):
        fan_in, fan_out = layer_dims[j], layer_dims[j + 1]
        key, kw, kb = jax.random.split(key, 3)
        bound = 1.0 / jnp.sqrt(fan_in)
        w = jax.random.uniform(kw, (fan_in, fan_out), jnp.float32,
                               minval=-bound, maxval=bound)
        b = jax.random.uniform(kb, (1, fan_out), jnp.float32,
                               minval=-bound, maxval=bound)
        params.append((w, b))
    return params


def reference_forward(s, params):
    """Pure-JAX f32 reference matching PyTorch semantics."""
    (w1, b1), (w2, b2), (w3, b3) = params
    h = jax.nn.relu(s @ w1 + b1)
    h = jax.nn.relu(h @ w2 + b2)
    logits = h @ w3 + b3
    return jax.nn.softmax(logits, axis=1)


def reference_forward_bf16(s, params):
    """Reference with the same bf16-operand / f32-accumulate casting as kernel."""
    (w1, b1), (w2, b2), (w3, b3) = params
    bf = jnp.bfloat16
    h = jnp.dot(s.astype(bf), w1.astype(bf), preferred_element_type=jnp.float32)
    h = jnp.maximum(h + b1, 0.0)
    h = jnp.dot(h.astype(bf), w2.astype(bf), preferred_element_type=jnp.float32)
    h = jnp.maximum(h + b2, 0.0)
    logits = jnp.dot(h.astype(bf), w3.astype(bf),
                     preferred_element_type=jnp.float32) + b3
    return jax.nn.softmax(logits, axis=1)


if __name__ == "__main__":
    # Small shapes consistent with the module: batch=64, state_dim=16,
    # hidden_shape=(32, 32), action_dim=8.  block_b=16 -> 4 grid steps to
    # exercise the batch pipeline.
    batch, state_dim, action_dim = 64, 16, 8
    hidden_shape = (32, 32)

    key = jax.random.PRNGKey(0)
    key, ks = jax.random.split(key)
    s = jax.random.normal(ks, (batch, state_dim), jnp.float32)
    params = init_params(key, state_dim, action_dim, hidden_shape)

    probs = policy_net_forward(s, params, block_b=16)
    probs = jax.block_until_ready(probs)

    assert probs.shape == (batch, action_dim)
    # Tight check against a matched-precision (bf16-operand) reference.
    ref_bf16 = reference_forward_bf16(s, params)
    assert jnp.allclose(probs, ref_bf16, atol=1e-4, rtol=1e-4)
    # Loose check against the pure-f32 PyTorch-semantics reference.
    ref_f32 = reference_forward(s, params)
    assert jnp.allclose(probs, ref_f32, atol=2e-2, rtol=2e-2)
    # Probabilities must sum to 1 (Newton-refined reciprocal keeps this tight).
    assert jnp.allclose(jnp.sum(probs, axis=1), 1.0, atol=1e-5)

    print("KERNEL_OK")
</pallas_src>

<mosaic_0001>
module attributes {stable_mosaic.version = 11 : i64} {
  func.func @policy_kernel(%arg0: i32, %arg1: memref<16x16xbf16, #tpu.memory_space<vmem>>, %arg2: memref<16x128xbf16, #tpu.memory_space<vmem>>, %arg3: memref<1x128xf32, #tpu.memory_space<vmem>>, %arg4: memref<128x128xbf16, #tpu.memory_space<vmem>>, %arg5: memref<1x128xf32, #tpu.memory_space<vmem>>, %arg6: memref<128x128xbf16, #tpu.memory_space<vmem>>, %arg7: memref<1x128xf32, #tpu.memory_space<vmem>>, %arg8: memref<16x128xf32, #tpu.memory_space<vmem>>) attributes {dimension_semantics = [#tpu.dimension_semantics<parallel>], iteration_bounds = array<i64: 4>, scalar_prefetch = 0 : i64, scratch_operands = 0 : i64, tpu.core_type = #tpu.core_type<tc>, window_params = [{transform_indices = @transform_0, window_bounds = array<i64: 16, 16>}, {pipeline_mode = #tpu.pipeline_mode<synchronous>, transform_indices = @transform_1, window_bounds = array<i64: 16, 128>}, {pipeline_mode = #tpu.pipeline_mode<synchronous>, transform_indices = @transform_2, window_bounds = array<i64: 1, 128>}, {pipeline_mode = #tpu.pipeline_mode<synchronous>, transform_indices = @transform_3, window_bounds = array<i64: 128, 128>}, {pipeline_mode = #tpu.pipeline_mode<synchronous>, transform_indices = @transform_4, window_bounds = array<i64: 1, 128>}, {pipeline_mode = #tpu.pipeline_mode<synchronous>, transform_indices = @transform_5, window_bounds = array<i64: 128, 128>}, {pipeline_mode = #tpu.pipeline_mode<synchronous>, transform_indices = @transform_6, window_bounds = array<i64: 1, 128>}, {transform_indices = @transform_7, window_bounds = array<i64: 16, 128>}]} {
    %c0 = arith.constant 0 : index
    %c0_0 = arith.constant 0 : index
    %0 = vector.load %arg1[%c0, %c0_0] : memref<16x16xbf16, #tpu.memory_space<vmem>>, vector<16x16xbf16>
    %c0_1 = arith.constant 0 : index
    %c0_2 = arith.constant 0 : index
    %1 = vector.load %arg2[%c0_1, %c0_2] : memref<16x128xbf16, #tpu.memory_space<vmem>>, vector<16x128xbf16>
    %cst = arith.constant dense<0.000000e+00> : vector<16x128xf32>
    %2 = tpu.matmul %0, %1, %cst {dimension_numbers = #tpu.dot_dimension_numbers<[1], [0], [0], [1], [0, 0, 1, 1], [], []>} : vector<16x16xbf16>, vector<16x128xbf16>, vector<16x128xf32> -> vector<16x128xf32>
    %c0_3 = arith.constant 0 : index
    %c0_4 = arith.constant 0 : index
    %3 = vector.load %arg3[%c0_3, %c0_4] : memref<1x128xf32, #tpu.memory_space<vmem>>, vector<1x128xf32>
    %4 = vector.broadcast %3 : vector<1x128xf32> to vector<16x128xf32>
    %5 = arith.addf %2, %4 : vector<16x128xf32>
    %cst_5 = arith.constant 0.000000e+00 : f32
    %6 = vector.broadcast %cst_5 : f32 to vector<16x128xf32>
    %7 = arith.maximumf %5, %6 : vector<16x128xf32>
    %8 = arith.truncf %7 : vector<16x128xf32> to vector<16x128xbf16>
    %c0_6 = arith.constant 0 : index
    %c0_7 = arith.constant 0 : index
    %9 = vector.load %arg4[%c0_6, %c0_7] : memref<128x128xbf16, #tpu.memory_space<vmem>>, vector<128x128xbf16>
    %cst_8 = arith.constant dense<0.000000e+00> : vector<16x128xf32>
    %10 = tpu.matmul %8, %9, %cst_8 {dimension_numbers = #tpu.dot_dimension_numbers<[1], [0], [0], [1], [0, 0, 1, 1], [], []>} : vector<16x128xbf16>, vector<128x128xbf16>, vector<16x128xf32> -> vector<16x128xf32>
    %c0_9 = arith.constant 0 : index
    %c0_10 = arith.constant 0 : index
    %11 = vector.load %arg5[%c0_9, %c0_10] : memref<1x128xf32, #tpu.memory_space<vmem>>, vector<1x128xf32>
    %12 = vector.broadcast %11 : vector<1x128xf32> to vector<16x128xf32>
    %13 = arith.addf %10, %12 : vector<16x128xf32>
    %cst_11 = arith.constant 0.000000e+00 : f32
    %14 = vector.broadcast %cst_11 : f32 to vector<16x128xf32>
    %15 = arith.maximumf %13, %14 : vector<16x128xf32>
    %16 = arith.truncf %15 : vector<16x128xf32> to vector<16x128xbf16>
    %c0_12 = arith.constant 0 : index
    %c0_13 = arith.constant 0 : index
    %17 = vector.load %arg6[%c0_12, %c0_13] : memref<128x128xbf16, #tpu.memory_space<vmem>>, vector<128x128xbf16>
    %cst_14 = arith.constant dense<0.000000e+00> : vector<16x128xf32>
    %18 = tpu.matmul %16, %17, %cst_14 {dimension_numbers = #tpu.dot_dimension_numbers<[1], [0], [0], [1], [0, 0, 1, 1], [], []>} : vector<16x128xbf16>, vector<128x128xbf16>, vector<16x128xf32> -> vector<16x128xf32>
    %c0_15 = arith.constant 0 : index
    %c0_16 = arith.constant 0 : index
    %19 = vector.load %arg7[%c0_15, %c0_16] : memref<1x128xf32, #tpu.memory_space<vmem>>, vector<1x128xf32>
    %20 = vector.broadcast %19 : vector<1x128xf32> to vector<16x128xf32>
    %21 = arith.addf %18, %20 : vector<16x128xf32>
    %cst_17 = arith.constant dense<0xFF800000> : vector<16xf32>
    %22 = vector.multi_reduction <maximumf>, %21, %cst_17 [1] : vector<16x128xf32> to vector<16xf32>
    %23 = vector.shape_cast %22 : vector<16xf32> to vector<16x1xf32>
    %24 = vector.broadcast %23 : vector<16x1xf32> to vector<16x128xf32>
    %25 = arith.subf %21, %24 : vector<16x128xf32>
    %26 = math.exp %25 : vector<16x128xf32>
    %cst_18 = arith.constant dense<0.000000e+00> : vector<16xf32>
    %27 = vector.multi_reduction <add>, %26, %cst_18 [1] : vector<16x128xf32> to vector<16xf32>
    %28 = vector.shape_cast %27 : vector<16xf32> to vector<16x1xf32>
    %29 = tpu.reciprocal %28 {approx = true} : vector<16x1xf32> -> vector<16x1xf32>
    %30 = arith.mulf %28, %29 : vector<16x1xf32>
    %cst_19 = arith.constant 2.000000e+00 : f32
    %31 = vector.broadcast %cst_19 : f32 to vector<16x1xf32>
    %32 = arith.subf %31, %30 : vector<16x1xf32>
    %33 = arith.mulf %29, %32 : vector<16x1xf32>
    %34 = vector.broadcast %33 : vector<16x1xf32> to vector<16x128xf32>
    %35 = arith.mulf %26, %34 : vector<16x128xf32>
    %c0_20 = arith.constant 0 : index
    %c0_21 = arith.constant 0 : index
    %36 = vector.load %arg8[%c0_20, %c0_21] : memref<16x128xf32, #tpu.memory_space<vmem>>, vector<16x128xf32>
    tpu.vector_store %arg8[%c0_20, %c0_21], %35 {strides = array<i32>} : memref<16x128xf32, #tpu.memory_space<vmem>>, vector<16x128xf32>,
    return
  }
  func.func @transform_0(%arg0: i32) -> (i32, i32) {
    %c0_i32 = arith.constant 0 : i32
    %c0_i32_0 = arith.constant 0 : i32
    return %arg0, %c0_i32 : i32, i32
  }
  func.func @transform_1(%arg0: i32) -> (i32, i32) {
    %c0_i32 = arith.constant 0 : i32
    %c0_i32_0 = arith.constant 0 : i32
    %c0_i32_1 = arith.constant 0 : i32
    return %c0_i32, %c0_i32_0 : i32, i32
  }
  func.func @transform_2(%arg0: i32) -> (i32, i32) {
    %c0_i32 = arith.constant 0 : i32
    %c0_i32_0 = arith.constant 0 : i32
    %c0_i32_1 = arith.constant 0 : i32
    return %c0_i32, %c0_i32_0 : i32, i32
  }
  func.func @transform_3(%arg0: i32) -> (i32, i32) {
    %c0_i32 = arith.constant 0 : i32
    %c0_i32_0 = arith.constant 0 : i32
    %c0_i32_1 = arith.constant 0 : i32
    return %c0_i32, %c0_i32_0 : i32, i32
  }
  func.func @transform_4(%arg0: i32) -> (i32, i32) {
    %c0_i32 = arith.constant 0 : i32
    %c0_i32_0 = arith.constant 0 : i32
    %c0_i32_1 = arith.constant 0 : i32
    return %c0_i32, %c0_i32_0 : i32, i32
  }
  func.func @transform_5(%arg0: i32) -> (i32, i32) {
    %c0_i32 = arith.constant 0 : i32
    %c0_i32_0 = arith.constant 0 : i32
    %c0_i32_1 = arith.constant 0 : i32
    return %c0_i32, %c0_i32_0 : i32, i32
  }
  func.func @transform_6(%arg0: i32) -> (i32, i32) {
    %c0_i32 = arith.constant 0 : i32
    %c0_i32_0 = arith.constant 0 : i32
    %c0_i32_1 = arith.constant 0 : i32
    return %c0_i32, %c0_i32_0 : i32, i32
  }
  func.func @transform_7(%arg0: i32) -> (i32, i32) {
    %c0_i32 = arith.constant 0 : i32
    %c0_i32_0 = arith.constant 0 : i32
    return %arg0, %c0_i32 : i32, i32
  }
}

</mosaic_0001>

<bundles_post_ra>
// kernel: tpu_custom_call.1
= control target key start
LH: loop header
LB: loop body
LE: loop exit
PB: predicated region body
PF: predicated region fallthrough
CT: control target
= control target key end

     0   :  { %12 = vsyncpa [#allocation3], 0  ;;  %s1315_s0 = inlined_call_operand.vmem [shape: bf16[64,16], index: 0, kind: input, shape index: {}]   ;;  %s1316_s1 = inlined_call_operand.vmem [shape: bf16[16,128], index: 1, kind: input, shape index: {}]   ;;  %s1317_s2 = inlined_call_operand.vmem [shape: f32[1,128], index: 2, kind: input, shape index: {}]   ;;  %s1318_s3 = inlined_call_operand.hbm [shape: bf16[128,128], index: 3, kind: input, shape index: {}]   ;;  %s1319_s4 = inlined_call_operand.vmem [shape: f32[1,128], index: 4, kind: input, shape index: {}]   ;;  %s1320_s5 = inlined_call_operand.hbm [shape: bf16[128,128], index: 5, kind: input, shape index: {}]   ;;  %s1321_s6 = inlined_call_operand.vmem [shape: f32[1,128], index: 6, kind: input, shape index: {}]   ;;  %s1322_s7 = inlined_call_operand.hbm [shape: f32[64,128], index: 7, kind: output, shape index: {}]  }
   0x1   :  { %13 = vsyncpa [#allocation6], 0 }
   0x2   :  { %14 = vsyncpa [#allocation4], 0 }
   0x3   :  { %16 = vsyncpa [#allocation4 + $0x1], 0  ;;  %s1106_s24 = smov 0   ;;  %s1108_s25 = smov 0  }
   0x4   :  { %s1110_s26 = smov 0   ;;  %s1112_s27 = smov 0  }
   0x5 LB: > { %s1127_s28 = sadd.s32 4294967295, %s1055_s27   ;;  %s732_s29 = sadd.s32 4294967294, %s1055_s27   ;;  %s1055_s27 = sphi %s1112_s27, %s1342_s27   ;;  %s1051_s26 = sphi %s1110_s26, %s1341_s26   ;;  %s1047_s25 = sphi %s1108_s25, %s1340_s25   ;;  %s1043_s24 = sphi %s1106_s24, %s1339_s24  }
   0x6   : > { %s1131_s30 = sadd.s32 1, %s1055_s27   ;;  %s181_s8 = sadd.s32 1, %s1051_s26 }
   0x7   : > { %s178_s9 = ssub.s32 %s1055_s27, %s1131_s30  ;;  %p191_p0 = scmp.ne.s32.totalorder %s1051_s26, %s1047_s25 }
   0x8   : > { %p179_p1 = scmp.eq.s32.totalorder %s178_s9, 0  ;;  %p192_p2 = scmp.eq.s32.totalorder %s1127_s28, 3 }
   0x9   : > { %p197_p3 = scmp.ne.s32.totalorder %s1047_s25, %s1043_s24  ;;  %p198_p4 = scmp.eq.s32.totalorder %s732_s29, 3 }
   0xa   : > { %s1142_s10 = scalar_select %p179_p1, %s1051_s26, %s181_s8  }
   0xb   : > { %p1144_p5 = por %p192_p2, %p191_p0  ;;  %p1148_p6 = por %p198_p4, %p197_p3 }
   0xc   : > { %1326 = sst [smem:[#allocation11_spill]] %s1142_s10  ;;  %p733_p7 = scmp.ge.s32.totalorder %s1055_s27, 1 }
   0xd   : > { %s1327_s11 = scalar_select %p1144_p5, 1, 0 }
   0xe   : > { %s1328_s12 = scalar_select %p1148_p6, 1, 0 }
   0xf   : > { %p205_p8 = scmp.lt.s32.totalorder %s1055_s27, 5  ;;  %p1323_p9 = scmp.eq.s32.totalorder %s1127_s28, 0 }
  0x10   : > { %s1057_s14 = smov [#allocation2]   ;;  %s1058_s17 = smov [#allocation5]  }
  0x11   : > { %p1155_p10 = pnand %p733_p7, %p205_p8  ;;  %s223_s15 = sshll.u32 %s1057_s14, 4  ;;  %s224_s15 = int_to_ptr.vmem [resolvable:$true] %s223_s15 }
  0x12   : > { %s239_s18 = sshll.u32 %s1058_s17, 4  ;;  %s929_s21 = scalar_lea.hbm %s1318_s3, 1024  ;;  %s1167_s18 = int_to_ptr.vmem [resolvable:$true] %s239_s18 }
  0x13   : > { %s1329_s13 = scalar_select %p1155_p10, 1, 0 }
  0x14   : > { %p847_p11 = pneg %p1155_p10  ;;  %p930_p13 = scmp.ne.s32.totalorder %s1318_s3, %s929_s21 }
  0x15   : > { %p936_p3 = scmp.lt.u32.totalorder %s929_s21, %s1318_s3 }
  0x16   : > { %p1163_p12 = pnand %p1323_p9, %p847_p11 }
  0x18   : > { %p931_p0 = pneg %p1163_p12 }
  0x1a   : > { %p932_p1 = pnand %p931_p0, %p930_p13 }
  0x1c   : > { %p933_p2 = pneg %p932_p1 }
  0x1e   : > { %p938_p4 = pnand %p936_p3, %p933_p2 }
  0x20   : > { %941 = shalt.err (!%p938_p4)
}
  0x21   : > { %s942_s9 = scalar_lea.vmem %s224_s15, 1024  ;;  %p950_p9 = scmp.lt.s32.totalorder %s224_s15, %s224_s15 }
  0x22   : > { %p943_p7 = scmp.ne.s32.totalorder %s224_s15, %s942_s9  ;;  %p951_p6 = scmp.lt.s32.totalorder %s942_s9, %s942_s9 }
  0x24   : > { %p945_p8 = pnand %p943_p7, %p931_p0  ;;  %p952_p5 = por %p951_p6, %p950_p9 }
  0x26   : > { %p946_p11 = pneg %p945_p8 }
  0x28   : > { %p953_p10 = pnand %p952_p5, %p946_p11 }
  0x2a   : > { %956 = shalt.err (!%p953_p10)
}
  0x2b   : > { %s1059_s14 = smov 64   ;;  %s1060_s17 = smov 4  }
  0x2c   : > { %850 = dma.hbm_to_vmem [thread:$0]  (!%p1163_p12), %s1318_s3, 1024, %s224_s15, [#allocation3], %s1059_s14, %s1059_s14, %s1060_s17  }
  0x2d   : > { %s957_s23 = scalar_lea.hbm %s1320_s5, 1024 }
  0x2e   : > { %p958_p13 = scmp.ne.s32.totalorder %s1320_s5, %s957_s23  ;;  %p964_p9 = scmp.lt.u32.totalorder %s957_s23, %s1320_s5 }
  0x30   : > { %p960_p5 = pnand %p958_p13, %p931_p0 }
  0x32   : > { %p961_p6 = pneg %p960_p5 }
  0x34   : > { %p966_p10 = pnand %p964_p9, %p961_p6 }
  0x36   : > { %969 = shalt.err (!%p966_p10)
}
  0x37   : > { %s970_s15 = scalar_lea.vmem %s1167_s18, 1024  ;;  %p978_p4 = scmp.lt.s32.totalorder %s1167_s18, %s1167_s18 }
  0x38   : > { %p971_p1 = scmp.ne.s32.totalorder %s1167_s18, %s970_s15  ;;  %p979_p7 = scmp.lt.s32.totalorder %s970_s15, %s970_s15 }
  0x3a   : > { %p973_p2 = pnand %p971_p1, %p931_p0  ;;  %p980_p8 = por %p979_p7, %p978_p4 }
  0x3c   : > { %p974_p3 = pneg %p973_p2 }
  0x3e   : > { %p981_p11 = pnand %p980_p8, %p974_p3 }
  0x40   : > { %984 = shalt.err (!%p981_p11)
}
  0x41   : > { %853 = dma.hbm_to_vmem [thread:$0]  (!%p1163_p12), %s1320_s5, 1024, %s1167_s18, [#allocation6], %s1059_s14, %s1059_s14, %s1060_s17  }
  0x42   : > { %p1331_p13 = scmp.ne.s32.totalorder %s1329_s13, 0 }
  0x43   : > { %p1332_p5 = scmp.eq.s32.totalorder (!%p1331_p13), %s1127_s28, 0 }
  0x44   : > { %267 = sbr.rel (%p1331_p13) target bundleno = 1078 (0x436), region = 48 }
  0x4b   : > { %1030 = dma.done.wait (%p1332_p5), [#allocation3], 1024   ;;  %p1333_p0 = pmov %p1332_p5 }
  0x4d   : > { %1032 = vsyncadd (%p1333_p0), [#allocation3], 4294966272  ;;  %p1334_p6 = pmov %p1333_p0 }
  0x4e   : > { %p1335_p9 = pmov %p1333_p0 }
  0x4f   : > { %1034 = dma.done.wait (%p1334_p6), [#allocation6], 1024  }
  0x50   : > { %1036 = vsyncadd (%p1335_p9), [#allocation6], 4294966272  ;;  %s741_s16 = sshll.u32 %s1127_s28, 1  ;;  %v1061_v0 = vmov 0.0   ;;  %vm1062_vm0 = vmmov 0   ;;  %v903_v1 = vld [vmem:[%s1316_s1] sm:$0xff]  }
  0x51   : > { %791 = vmatprep.subr.bf16.mxu0 %v1061_v0  ;;  %793 = vmatprep.mubr.msk.bf16.mxu0 %vm1062_vm0, %v1061_v0  ;;  %p304_p12 = scmp.lt.s32.totalorder %s741_s16, 7  ;;  %vm333_vm1 = vcmask 130048   ;;  %v905_v3 = vld [vmem:[#allocation2] sm:$0xff]   ;;  %v906_v4 = vld [vmem:[#allocation2 + $0x8] sm:$0xff]   ;;  %v907_v5 = vld [vmem:[#allocation2 + $0x10] sm:$0xff]   ;;  %s300_s10 = sand.u32 1, %s1047_s25  }
  0x52   : > { %797 = vmatprep.subr.bf16.mxu1 %v1061_v0  ;;  %813 = vmatprep.mubr.msk.bf16.mxu1 %vm1062_vm0, %v1061_v0  ;;  %v908_v6 = vld [vmem:[#allocation2 + $0x18] sm:$0xff]   ;;  %v909_v7 = vld [vmem:[#allocation2 + $0x20] sm:$0xff]   ;;  %v910_v8 = vld [vmem:[#allocation2 + $0x28] sm:$0xff]   ;;  %s740_s19 = sshll.u32 %s300_s10, 4  ;;  %s770_s18 = sshll.u32 %s1127_s28, 8 }
  0x53   : > { %s1344_s16 = smov (!%p304_p12, %s741_s16), 7  ;;  %792 = vmatpush3.bf16.msra.mxu0 %v903_v1  ;;  %798 = vmatpush3.bf16.msra.mxu1 %v905_v3  ;;  %v911_v9 = vld [vmem:[#allocation2 + $0x30] sm:$0xff]   ;;  %v912_v10 = vld [vmem:[#allocation2 + $0x38] sm:$0xff]   ;;  %v913_v11 = vld [vmem:[#allocation5] sm:$0xff]   ;;  %s1270_s20 = scalar_lea.hbm %s1322_s7, %s770_s18 }
  0x54   : > { %s742_s13 = sshll.u32 %s1344_s16, 2  ;;  %817 = vmatprep.subr.bf16.mxu0 %v1061_v0  ;;  %799 = vmatprep.subr.bf16.mxu1 %v1061_v0  ;;  %v914_v12 = vld [vmem:[#allocation5 + $0x8] sm:$0xff]   ;;  %v915_v13 = vld [vmem:[#allocation5 + $0x10] sm:$0xff]   ;;  %v916_v14 = vld [vmem:[#allocation5 + $0x18] sm:$0xff]   ;;  %s302_s16 = scalar_lea.vmem [#allocation7], %s740_s19 }
  0x55   : > { %s307_s17 = scalar_lea.vmem %s1315_s0, %s742_s13  ;;  %v917_v15 = vld [vmem:[#allocation5 + $0x20] sm:$0xff]   ;;  %v918_v16 = vld [vmem:[#allocation5 + $0x28] sm:$0xff]   ;;  %v919_v27 = vld [vmem:[#allocation5 + $0x30] sm:$0xff]   ;;  %s648_s13 = sshll.u32 %s302_s16, 4  ;;  %s1272_s13 = int_to_ptr.vmem [resolvable:$true] %s648_s13 }
  0x56   : > { %v904_v2 = vld [vmem:[%s307_s17] sm:$0xff]   ;;  %v920_v28 = vld [vmem:[#allocation5 + $0x38] sm:$0xff]   ;;  %s1274_s21 = scalar_lea.sflag [#allocation4], %s300_s10  ;;  %s985_s22 = scalar_lea.vmem %s1272_s13, 256 }
  0x57   : > { %794 = vmatmul.mubr.msk.bf16.vlgmr.msra.gmra.mrb[0].mxu0 %vm333_vm1, %v904_v2  ;;  %800 = vmatpush3.bf16.msra.mxu1 %v906_v4  ;;  %v743_v17 = vld [vmem:[%s1317_s2] ss:$0 sm:$0xff]  ;;  %p986_p10 = scmp.ne.s32.totalorder %s1272_s13, %s985_s22  ;;  %p1336_p1 = scmp.ne.s32.totalorder %s1327_s11, 0 }
  0x58   : > { %833 = vmatprep.mubr.msk.bf16.mxu0 %vm1062_vm0, %v1061_v0  ;;  %801 = vmatprep.subr.bf16.mxu1 %v1061_v0  ;;  %v747_v29 = vld [vmem:[%s1319_s4] ss:$0 sm:$0xff]  ;;  %s1063_s28 = smov [#allocation7]  }
  0x59   : > { %818 = vmatpush3.bf16.msra.mxu0 %v913_v11  ;;  %v756_v39 = vld [vmem:[%s1321_s6] ss:$0 sm:$0xff]  ;;  %p987_p2 = pnand %p986_p10, %p1336_p1  ;;  %s989_s23 = sshll.u32 %s1063_s28, 4  ;;  %s990_s23 = int_to_ptr.vmem [resolvable:$false] %s989_s23 }
  0x5a   : > { %819 = vmatprep.subr.bf16.mxu0 %v1061_v0  ;;  %s991_s29 = scalar_lea.vmem %s990_s23, 512  ;;  %p992_p4 = scmp.lt.s32.totalorder %s1272_s13, %s990_s23 }
  0x5b   : > { %802 = vmatpush3.bf16.msra.mxu1 %v907_v5  ;;  %p988_p3 = pneg %p987_p2  ;;  %p993_p7 = scmp.lt.s32.totalorder %s991_s29, %s985_s22 }
  0x5c   : > { %803 = vmatprep.subr.bf16.mxu1 %v1061_v0 }
  0x5d   : > { %820 = vmatpush3.bf16.msra.mxu0 %v914_v12  ;;  %p994_p8 = por %p993_p7, %p992_p4 }
  0x5e   : > { %821 = vmatprep.subr.bf16.mxu0 %v1061_v0 }
  0x5f   : > { %804 = vmatpush3.bf16.msra.mxu1 %v908_v6  ;;  %p995_p11 = pnand %p994_p8, %p988_p3 }
  0x60   : > { %805 = vmatprep.subr.bf16.mxu1 %v1061_v0 }
  0x61   : > { %822 = vmatpush3.bf16.msra.mxu0 %v915_v13 }
  0x62   : > { %823 = vmatprep.subr.bf16.mxu0 %v1061_v0 }
  0x63   : > { %806 = vmatpush3.bf16.msra.mxu1 %v909_v7 }
  0x64   : > { %807 = vmatprep.subr.bf16.mxu1 %v1061_v0 }
  0x65   : > { %824 = vmatpush3.bf16.msra.mxu0 %v916_v14 }
  0x66   : > { %825 = vmatprep.subr.bf16.mxu0 %v1061_v0 }
  0x67   : > { %808 = vmatpush3.bf16.msra.mxu1 %v910_v8 }
  0x68   : > { %809 = vmatprep.subr.bf16.mxu1 %v1061_v0 }
  0x69   : > { %826 = vmatpush3.bf16.msra.mxu0 %v917_v15 }
  0x6a   : > { %827 = vmatprep.subr.bf16.mxu0 %v1061_v0 }
  0x6b   : > { %810 = vmatpush3.bf16.msra.mxu1 %v911_v9 }
  0x6c   : > { %811 = vmatprep.subr.bf16.mxu1 %v1061_v0 }
  0x6d   : > { %828 = vmatpush3.bf16.msra.mxu0 %v918_v16 }
  0x6e   : > { %829 = vmatprep.subr.bf16.mxu0 %v1061_v0 }
  0x6f   : > { %812 = vmatpush3.bf16.msra.mxu1 %v912_v10 }
  0x71   : > { %830 = vmatpush3.bf16.msra.mxu0 %v919_v27 }
  0x72   : > { %831 = vmatprep.subr.bf16.mxu0 %v1061_v0 }
  0x75   : > { %832 = vmatpush3.bf16.msra.mxu0 %v920_v28 }
 0x12a   : > { %v371_v18 = vpop.f32.mrb[0].mxu0 }
 0x12b   : > { %v372_v19 = vadd.f32 %v743_v17, %v371_v18  ;;  %v795_v20 = vpop.f32.mrb[1].mxu0 }
 0x12c   : > { %v374_v21 = vpop.f32.mrb[2].mxu0 }
 0x12d   : > { %v375_v22 = vadd.f32 %v743_v17, %v374_v21  ;;  %v796_v23 = vpop.f32.mrb[3].mxu0  ;;  %v378_v24 = vmax.f32 %v372_v19, 0.0 }
 0x12f   : > { %v379_v25 = vmax.f32 %v375_v22, 0.0 }
 0x131   : > { %v380_v26 = vpack.c.bf16 %v379_v25, %v378_v24 }
 0x133   : > { %814 = vmatmul.mubr.bf16.vlgmr.msra.gmra.mrb[0].mxu1 %v380_v26 }
 0x206   : > { %v486_v30 = vpop.f32.mrb[0].mxu1 }
 0x207   : > { %v487_v31 = vadd.f32 %v747_v29, %v486_v30  ;;  %v815_v32 = vpop.f32.mrb[1].mxu1 }
 0x208   : > { %v489_v33 = vpop.f32.mrb[2].mxu1 }
 0x209   : > { %v490_v34 = vadd.f32 %v747_v29, %v489_v33  ;;  %v816_v35 = vpop.f32.mrb[3].mxu1  ;;  %v493_v36 = vmax.f32 %v487_v31, 0.0 }
 0x20b   : > { %v494_v37 = vmax.f32 %v490_v34, 0.0 }
 0x20d   : > { %v495_v38 = vpack.c.bf16 %v494_v37, %v493_v36 }
 0x20f   : > { %834 = vmatmul.mubr.bf16.vlgmr.msra.gmra.mrb[4].mxu0 %v495_v38 }
 0x2e2   : > { %v601_v40 = vpop.f32.mrb[4].mxu0 }
 0x2e3   : > { %v602_v41 = vadd.f32 %v756_v39, %v601_v40  ;;  %v835_v42 = vpop.f32.mrb[5].mxu0 }
 0x2e4   : > { %v604_v43 = vpop.f32.mrb[6].mxu0 }
 0x2e5   : > { %608 = vmax.xlane.f32.xlu0 %v602_v41  ;;  %v836_v44 = vpop.f32.mrb[7].mxu0  ;;  %v605_v45 = vadd.f32 %v756_v39, %v604_v43 }
 0x2e9   : > { %610 = vmax.xlane.f32.xlu0 %v605_v45 }
 0x372   : > { %v609_v46 = vpop.xlane.xlu0 %608 }
 0x373   : > { %v612_v47 = vsub.f32 %v602_v41, %v609_v46 }
 0x375   : > { %v614_v48 = vmul.f32 1.442695, %v612_v47 }
 0x376   : > { %v611_v49 = vpop.xlane.xlu0 %610 }
 0x377   : > { %921 = vpow2.f32 %v614_v48  ;;  %v613_v50 = vsub.f32 %v605_v45, %v611_v49 }
 0x379   : > { %v616_v51 = vmul.f32 1.442695, %v613_v50 }
 0x37b   : > { %923 = vpow2.f32 %v616_v51 }
 0x381   : > { %v922_v52 = vpop.eup %921 }
 0x382   : > { %618 = vadd.xlane.f32.xlu1 %v922_v52 }
 0x385   : > { %v924_v53 = vpop.eup %923 }
 0x386   : > { %620 = vadd.xlane.f32.xlu1 %v924_v53 }
 0x40f   : > { %v619_v54 = vpop.xlane.xlu1 %618 }
 0x410   : > { %925 = vrcp.f32 %v619_v54 }
 0x413   : > { %v621_v55 = vpop.xlane.xlu1 %620 }
 0x414   : > { %927 = vrcp.f32 %v621_v55 }
 0x41a   : > { %v926_v56 = vpop.eup %925 }
 0x41b   : > { %v624_v57 = vmul.f32 %v926_v56, %v619_v54 }
 0x41d   : > { %v626_v58 = vsub.f32 2.0, %v624_v57 }
 0x41e   : > { %v928_v59 = vpop.eup %927 }
 0x41f   : > { %v628_v60 = vmul.f32 %v926_v56, %v626_v58  ;;  %v625_v61 = vmul.f32 %v928_v59, %v621_v55 }
 0x421   : > { %v630_v62 = vmul.f32 %v922_v52, %v628_v60  ;;  %v627_v63 = vsub.f32 2.0, %v625_v61 }
 0x423   : > { %632 = vst [vmem:[%s302_s16] sm:$0xff] %v630_v62  ;;  %v629_v0 = vmul.f32 %v928_v59, %v627_v63 }
 0x425   : > { %v631_v1 = vmul.f32 %v924_v53, %v629_v0 }
 0x427   : > { %633 = vst [vmem:[%s302_s16 + $0x8] sm:$0xff] %v631_v1 }
 0x428   : > { %998 = shalt.err (!%p995_p11)
}
 0x429   : > { %s999_s8 = scalar_lea.hbm %s1270_s20, 256  ;;  %s1003_s10 = scalar_lea.hbm %s1322_s7, 1024 }
 0x42a   : > { %p1000_p13 = scmp.ne.s32.totalorder %s1270_s20, %s999_s8  ;;  %p1004_p6 = scmp.lt.u32.totalorder %s1270_s20, %s1322_s7 }
 0x42b   : > { %p1005_p9 = scmp.lt.u32.totalorder %s1003_s10, %s999_s8  ;;  %p1007_p10 = scmp.lt.u32.totalorder %s999_s8, %s1270_s20 }
 0x42c   : > { %p1001_p5 = pnand %p1000_p13, %p1336_p1 }
 0x42d   : > { %p1006_p12 = por %p1005_p9, %p1004_p6 }
 0x42e   : > { %p1002_p0 = pneg %p1001_p5 }
 0x42f   : > { %p1008_p2 = por %p1007_p10, %p1006_p12 }
 0x431   : > { %p1009_p3 = pnand %p1008_p2, %p1002_p0 }
 0x433   : > { %1012 = shalt.err (!%p1009_p3)
}
 0x434   : > { %s1064_s18 = smov 128   ;;  %s1065_s14 = smov 8  }
 0x435   : > { %845 = dma.vmem_to_hbm [thread:$0]  (%p1336_p1), %s1272_s13, 256, %s1270_s20, %s1274_s21, %s1064_s18, %s1064_s18, %s1065_s14  }
 0x436 PF: > { %p862_p4 = scmp.ge.s32.totalorder %s1055_s27, 2  ;;  %s663_s17 = sand.u32 1, %s1043_s24  }
 0x437   : > { %p1337_p7 = scmp.ne.s32.totalorder %s1328_s12, 0  ;;  %s664_s22 = scalar_lea.sflag [#allocation4], %s663_s17 }
 0x439   : > { %p855_p8 = pnand %p862_p4, %p1337_p7 }
 0x43b   : > { %1038 = dma.done.wait (!%p855_p8), %s664_s22, 256  }
 0x43c   : > { %1040 = vsyncadd (!%p855_p8), %s664_s22, 4294967040  ;;  %s1338_s28 = sld [smem:[#allocation11_spill]]  ;;  %p19_p11 = scmp.ge.s32.totalorder %s1131_s30, 6  }
 0x43d   : > { %s1339_s24 = smov %s1047_s25  ;;  %s1340_s25 = smov %s1051_s26 }
 0x43e   : > { %s1342_s27 = smov %s1131_s30  ;;  %21 = sbr.rel (!%p19_p11) target bundleno = 5 (0x5), region = 92 }
 0x442   : > { %s1341_s26 = smov %s1338_s28 }
 0x445   :  { %669 = vsyncpa [#allocation3], 1 }
 0x446   :  { %671 = vsyncpa [#allocation3 + $0x1], 1 }
 0x447   :  { %672 = vsyncpa [#allocation6], 1 }
 0x448   :  { %673 = vsyncpa [#allocation4], 1 }
 0x449   :  { %675 = vsyncpa [#allocation4 + $0x1], 1 }

</bundles_post_ra>
